<compile_context>
chip_gen: v7x
topology: tpu7x:2x2x1
jax: 0.10.0
libtpu: 0.0.40
codegen_flags: <defaults>
</compile_context>

<pallas_src>
import functools
from math import comb

import jax
import jax.numpy as jnp
from jax import lax
from jax.experimental import pallas as pl
from jax.experimental.pallas import tpu as pltpu

LANES = 128
SUBLANES = 8
MAX_BLOCK_ROWS = 2048   # 1 MiB per f32 input buffer; ~4 MiB double-buffered for x+t (safe v5e/v6e/v7x)
CHUNK_ROWS = 512        # inner elementwise chunk -> bounded live set of f32 temporaries (~2 MiB)


def _stable_sigmoid(x):
    e_na = jnp.exp(-jnp.abs(x))
    # TODO(synk): on v7x (EUP-bound) consider pl.reciprocal(1.0 + e_na, approx=True) for the divide.
    return jnp.where(x >= 0.0, 1.0, e_na) / (1.0 + e_na)


def _colsum(v):
    """(rows, 128) -> (8, 128) column partial sums; pure VPU adds, no cross-lane traffic."""
    return jnp.sum(v.reshape(v.shape[0] // SUBLANES, SUBLANES, LANES), axis=0)


def _valid_mask(global_row0, rows_c, n_valid):
    """Element-validity mask for a (rows_c, 128) chunk whose first row is global row `global_row0`."""
    rid = lax.broadcasted_iota(jnp.int32, (rows_c, LANES), 0)
    lid = lax.broadcasted_iota(jnp.int32, (rows_c, LANES), 1)
    return (global_row0 + rid) * LANES + lid < n_valid


def _iter_chunks(block_rows, fn):
    """Run fn(row_offset, chunk_rows) over `block_rows` rows in bounded chunks (all multiples of 8)."""
    chunk = min(CHUNK_ROWS, block_rows)
    full = block_rows // chunk
    rem = block_rows - full * chunk
    if full == 1 and rem == 0:
        fn(0, chunk)
        return

    def body(c, carry):
        fn(pl.multiple_of(c * chunk, chunk), chunk)
        return carry

    lax.fori_loop(0, full, body, 0, unroll=True)
    if rem:
        fn(full * chunk, rem)


def _partials_kernel(x_ref, t_ref, out_ref, *, n_pows, n_valid, block_rows,
                     tiles_per_slice, needs_mask):
    """Single pass: accumulate [sum(exp(p)^k) for k=1..n_pows, sum(bce)] as (8,128) column sums."""
    s = pl.program_id(0)
    t_idx = pl.program_id(1)

    @pl.when(t_idx == 0)
    def _init():
        out_ref[...] = jnp.zeros_like(out_ref)

    tile_row0 = (s * tiles_per_slice + t_idx) * block_rows   # logical (unclamped) global row

    def process(row0, rows_c):
        x = x_ref[pl.ds(row0, rows_c), :].astype(jnp.float32)
        t = t_ref[pl.ds(row0, rows_c), :].astype(jnp.float32)
        p = _stable_sigmoid(x)
        e_p = jnp.exp(p)                                     # softmax numerator exp(sigmoid(x))
        # BCE from the f32-rounded probability, with PyTorch's -100 log clamp (this reproduces the
        # reference's 1-p==0 rounding for large positive x, unlike a softplus formulation).
        log_p = jnp.maximum(jnp.log(p), -100.0)
        log_1mp = jnp.maximum(jnp.log(1.0 - p), -100.0)
        bce = -(t * log_p + (1.0 - t) * log_1mp)
        if needs_mask:
            valid = _valid_mask(tile_row0 + row0, rows_c, n_valid)
            e_p = jnp.where(valid, e_p, 0.0)                 # zeroes every e_p^k as well
            bce = jnp.where(valid, bce, 0.0)
        pw = e_p
        for k in range(n_pows):
            out_ref[k * SUBLANES:(k + 1) * SUBLANES, :] += _colsum(pw)
            if k + 1 < n_pows:
                pw = pw * e_p
        out_ref[n_pows * SUBLANES:(n_pows + 1) * SUBLANES, :] += _colsum(bce)

    _iter_chunks(block_rows, process)


def _focal_pass_kernel(scal_ref, x_ref, out_ref, *, gamma, eps, n_valid, block_rows,
                       tiles_per_slice, needs_mask):
    """Second pass (non-integer gamma fallback): accumulate sum((1 - clip(e_p/D))^gamma)."""
    s = pl.program_id(0)
    t_idx = pl.program_id(1)

    @pl.when(t_idx == 0)
    def _init():
        out_ref[...] = jnp.zeros_like(out_ref)

    inv_d = scal_ref[0]
    tile_row0 = (s * tiles_per_slice + t_idx) * block_rows

    def process(row0, rows_c):
        x = x_ref[pl.ds(row0, rows_c), :].astype(jnp.float32)
        p = _stable_sigmoid(x)
        e_p = jnp.exp(p)
        logit = jnp.clip(e_p * inv_d, eps, 1.0 - eps)        # softmax over the flattened vector
        focal = jnp.exp(gamma * jnp.log1p(-logit))           # (1 - logit) ** gamma, 1-logit >= eps
        if needs_mask:
            valid = _valid_mask(tile_row0 + row0, rows_c, n_valid)
            focal = jnp.where(valid, focal, 0.0)
        out_ref[...] += _colsum(focal)

    _iter_chunks(block_rows, process)


def focal_loss(x, target, gamma: float = 2.0, eps: float = 1e-07,
               _max_block_rows: int = MAX_BLOCK_ROWS):
    n = int(x.size)
    xf = x.reshape(-1)
    tf = target.reshape(-1)
    # Stream native f32/bf16 (cast happens in-kernel); otherwise cast once.
    if xf.dtype not in (jnp.float32, jnp.bfloat16):
        xf = xf.astype(jnp.float32)
    if tf.dtype not in (jnp.float32, jnp.bfloat16):
        tf = tf.astype(jnp.float32)

    # Pad only up to an (8,128)-tile boundary (no copy for the common n % 1024 == 0 case); partial
    # tiles beyond that are handled by the in-kernel iota mask instead of a full-array jnp.pad.
    n_pad = -(-n // 1024) * 1024
    if n_pad != n:
        # TODO(synk): handle this sub-1024 remainder with a separate tiny kernel to avoid the copy.
        xf = jnp.pad(xf, (0, n_pad - n))
        tf = jnp.pad(tf, (0, n_pad - n))
    rows = n_pad // LANES                                   # multiple of 8
    x2 = xf.reshape(rows, LANES)
    t2 = tf.reshape(rows, LANES)

    block_rows = min(rows, _max_block_rows)                 # full dim, or a multiple of 8/16/32
    n_tiles = (rows + block_rows - 1) // block_rows
    n_slices = 2 if n_tiles >= 2 else 1                     # leading "parallel" axis (dual-TC on v7x)
    tiles_per_slice = (n_tiles + n_slices - 1) // n_slices
    needs_mask = (n_slices * tiles_per_slice * block_rows * LANES) != n

    # Integer gamma -> single pass via binomial expansion of (1 - e_p/D)^g; guarded so the eps clip on
    # the softmax output provably cannot bind (softmax values lie in [1/(e*n), e/n]).
    g_int = int(gamma) if float(gamma) == int(gamma) and 0.0 <= gamma <= 8.0 else None
    use_binomial = (g_int is not None) and n >= 4 and (eps * 2.718281828459045 * n) < 1.0
    n_pows = max(g_int, 1) if use_binomial else 1
    out_rows = (n_pows + 1) * SUBLANES                      # [S_1 .. S_npows, bce] column accumulators

    last_tile = n_tiles - 1

    def data_index(si, ti):                                 # clamp so duplicated tail tiles stay in range
        return (jnp.minimum(si * tiles_per_slice + ti, last_tile), 0)

    data_spec = pl.BlockSpec((block_rows, LANES), data_index)
    grid = (n_slices, tiles_per_slice)
    # TODO(synk): on v7x, move the slice axis to CORE_PARALLEL / pl.core_map to pin one slice per
    # TensorCore; "parallel" is correct everywhere and enables sharding where available.
    cparams = pltpu.CompilerParams(dimension_semantics=("parallel", "arbitrary"))

    kernel = functools.partial(
        _partials_kernel, n_pows=n_pows, n_valid=n, block_rows=block_rows,
        tiles_per_slice=tiles_per_slice, needs_mask=needs_mask)
    cost = pl.CostEstimate(
        flops=30 * n, transcendentals=5 * n,
        bytes_accessed=int(x2.size) * x2.dtype.itemsize + int(t2.size) * t2.dtype.itemsize
        + n_slices * out_rows * LANES * 4)

    partials = pl.pallas_call(
        kernel,
        out_shape=jax.ShapeDtypeStruct((n_slices, out_rows, LANES), jnp.float32),
        grid=grid,
        in_specs=[data_spec, data_spec],
        out_specs=pl.BlockSpec((None, out_rows, LANES), lambda si, ti: (si, 0, 0)),
        compiler_params=cparams,
        cost_estimate=cost,
    )(x2, t2)

    sums = jnp.sum(partials.reshape(n_slices, n_pows + 1, SUBLANES, LANES), axis=(0, 2, 3))
    denom = sums[0]                                         # D = sum(exp(sigmoid(x))) over valid elems
    sum_bce = sums[n_pows]
    nf = jnp.float32(n)

    if use_binomial:
        inv_d = 1.0 / denom
        mean_focal = jnp.float32(0.0)
        for k in range(g_int + 1):                          # mean_i (1 - e_p_i/D)^g, binomially
            s_k = nf if k == 0 else sums[k - 1]
            mean_focal = mean_focal + (((-1.0) ** k) * comb(g_int, k)) * (s_k / nf) * (inv_d ** k)
        return (sum_bce / nf) * mean_focal

    # Two-pass fallback: re-stream x with the softmax denominator in SMEM (non-integer gamma, or
    # N large enough that the eps clip on the softmax output could bind).
    inv_d_arr = jnp.reshape(1.0 / denom, (1,)).astype(jnp.float32)
    fkernel = functools.partial(
        _focal_pass_kernel, gamma=float(gamma), eps=float(eps), n_valid=n,
        block_rows=block_rows, tiles_per_slice=tiles_per_slice, needs_mask=needs_mask)
    focal_partials = pl.pallas_call(
        fkernel,
        out_shape=jax.ShapeDtypeStruct((n_slices, SUBLANES, LANES), jnp.float32),
        grid=grid,
        in_specs=[pl.BlockSpec(memory_space=pltpu.MemorySpace.SMEM), data_spec],
        out_specs=pl.BlockSpec((None, SUBLANES, LANES), lambda si, ti: (si, 0, 0)),
        compiler_params=cparams,
        cost_estimate=pl.CostEstimate(flops=10 * n, transcendentals=4 * n,
                                      bytes_accessed=int(x2.size) * x2.dtype.itemsize),
    )(inv_d_arr, x2)
    sum_focal = jnp.sum(focal_partials)
    return (sum_bce / nf) * (sum_focal / nf)


def _focal_loss_ref(x, target, gamma=2.0, eps=1e-07):
    """Pure-JAX mirror of the PyTorch module (including the -100 BCE log clamp)."""
    p = jax.nn.sigmoid(x).reshape(-1).astype(jnp.float32)
    t = target.reshape(-1).astype(jnp.float32)
    logit = jax.nn.softmax(p, axis=-1)
    logit = jnp.clip(logit, eps, 1.0 - eps)
    log_p = jnp.maximum(jnp.log(p), -100.0)
    log_1mp = jnp.maximum(jnp.log(1.0 - p), -100.0)
    bce = -(t * log_p + (1.0 - t) * log_1mp)
    loss_bce = jnp.mean(bce)
    return jnp.mean(loss_bce * (1.0 - logit) ** gamma)


if __name__ == "__main__":
    key = jax.random.PRNGKey(0)
    kx, kt = jax.random.split(key)

    # Primary example (NCHW segmentation-style logits), gamma=2 -> single-pass binomial path.
    x = jax.random.normal(kx, (2, 4, 16, 16), dtype=jnp.float32)
    target = (jax.random.uniform(kt, (2, 4, 16, 16)) > 0.5).astype(jnp.float32)
    loss = jax.block_until_ready(focal_loss(x, target, gamma=2.0, eps=1e-07))
    ref = _focal_loss_ref(x, target, gamma=2.0, eps=1e-07)
    assert jnp.allclose(loss, ref, rtol=1e-4, atol=1e-6), (loss, ref)

    # Ragged size: exercises the in-kernel iota mask (no full-array padding to the block size).
    xr = jax.random.normal(kx, (3, 5, 7, 11), dtype=jnp.float32)
    tr = (jax.random.uniform(kt, (3, 5, 7, 11)) > 0.5).astype(jnp.float32)
    lr = jax.block_until_ready(focal_loss(xr, tr, gamma=2.0, eps=1e-07))
    rr = _focal_loss_ref(xr, tr, gamma=2.0, eps=1e-07)
    assert jnp.allclose(lr, rr, rtol=1e-4, atol=1e-6), (lr, rr)

    # Non-integer gamma -> two-pass fallback (denominator kernel + SMEM-scalar focal kernel).
    lg = jax.block_until_ready(focal_loss(x, target, gamma=1.5, eps=1e-07))
    rg = _focal_loss_ref(x, target, gamma=1.5, eps=1e-07)
    assert jnp.allclose(lg, rg, rtol=1e-4, atol=1e-6), (lg, rg)

    # Multi-tile / multi-slice structural check (small block size forced purely for testing).
    xm = jax.random.normal(kx, (2, 4, 32, 16), dtype=jnp.float32)
    tmv = (jax.random.uniform(kt, (2, 4, 32, 16)) > 0.5).astype(jnp.float32)
    lm = jax.block_until_ready(focal_loss(xm, tmv, gamma=2.0, eps=1e-07, _max_block_rows=8))
    rm = _focal_loss_ref(xm, tmv, gamma=2.0, eps=1e-07)
    assert jnp.allclose(lm, rm, rtol=1e-4, atol=1e-6), (lm, rm)

    print("KERNEL_OK")
</pallas_src>

<mosaic_0001>
module attributes {stable_mosaic.version = 11 : i64} {
  func.func @_partials_kernel(%arg0: i32, %arg1: i32, %arg2: memref<16x128xf32, #tpu.memory_space<vmem>>, %arg3: memref<16x128xf32, #tpu.memory_space<vmem>>, %arg4: memref<1x24x128xf32, #tpu.memory_space<vmem>>) attributes {dimension_semantics = [#tpu.dimension_semantics<parallel>, #tpu.dimension_semantics<arbitrary>], iteration_bounds = array<i64: 1, 1>, scalar_prefetch = 0 : i64, scratch_operands = 0 : i64, tpu.core_type = #tpu.core_type<tc>, window_params = [{transform_indices = @transform_0, window_bounds = array<i64: 16, 128>}, {transform_indices = @transform_1, window_bounds = array<i64: 16, 128>}, {transform_indices = @transform_2, window_bounds = array<i64: 1, 24, 128>}]} {
    %c0_i32 = arith.constant 0 : i32
    %0 = arith.cmpi eq, %arg1, %c0_i32 : i32
    %1 = arith.extui %0 : i1 to i32
    %c0_i32_0 = arith.constant 0 : i32
    %2 = arith.cmpi ne, %1, %c0_i32_0 : i32
    scf.if %2 {
      %cst_31 = arith.constant 0.000000e+00 : f32
      %57 = vector.broadcast %cst_31 : f32 to vector<24x128xf32>
      %c0_32 = arith.constant 0 : index
      %c0_33 = arith.constant 0 : index
      %c0_34 = arith.constant 0 : index
      %58 = vector.load %arg4[%c0_32, %c0_33, %c0_34] : memref<1x24x128xf32, #tpu.memory_space<vmem>>, vector<1x24x128xf32>
      %59 = vector.shape_cast %58 : vector<1x24x128xf32> to vector<24x128xf32>
      %60 = vector.shape_cast %57 : vector<24x128xf32> to vector<1x24x128xf32>
      tpu.vector_store %arg4[%c0_32, %c0_33, %c0_34], %60 {strides = array<i32>} : memref<1x24x128xf32, #tpu.memory_space<vmem>>, vector<1x24x128xf32>,
    } else {
    }
    %c0 = arith.constant 0 : index
    %c0_1 = arith.constant 0 : index
    %3 = vector.load %arg2[%c0, %c0_1] : memref<16x128xf32, #tpu.memory_space<vmem>>, vector<16x128xf32>
    %c0_2 = arith.constant 0 : index
    %c0_3 = arith.constant 0 : index
    %4 = vector.load %arg3[%c0_2, %c0_3] : memref<16x128xf32, #tpu.memory_space<vmem>>, vector<16x128xf32>
    %5 = math.absf %3 : vector<16x128xf32>
    %cst = arith.constant 0.000000e+00 : f32
    %6 = vector.broadcast %cst : f32 to vector<16x128xf32>
    %7 = arith.subf %6, %5 : vector<16x128xf32>
    %8 = math.exp %7 : vector<16x128xf32>
    %cst_4 = arith.constant 0.000000e+00 : f32
    %9 = vector.broadcast %cst_4 : f32 to vector<16x128xf32>
    %10 = arith.cmpf oge, %3, %9 : vector<16x128xf32>
    %cst_5 = arith.constant 1.000000e+00 : f32
    %11 = vector.broadcast %cst_5 : f32 to vector<16x128xf32>
    %12 = arith.select %10, %11, %8 : vector<16x128xi1>, vector<16x128xf32>
    %cst_6 = arith.constant 1.000000e+00 : f32
    %13 = vector.broadcast %cst_6 : f32 to vector<16x128xf32>
    %14 = arith.addf %13, %8 : vector<16x128xf32>
    %15 = arith.divf %12, %14 : vector<16x128xf32>
    %16 = math.exp %15 : vector<16x128xf32>
    %17 = math.log %15 : vector<16x128xf32>
    %cst_7 = arith.constant -1.000000e+02 : f32
    %18 = vector.broadcast %cst_7 : f32 to vector<16x128xf32>
    %19 = arith.maximumf %17, %18 : vector<16x128xf32>
    %cst_8 = arith.constant 1.000000e+00 : f32
    %20 = vector.broadcast %cst_8 : f32 to vector<16x128xf32>
    %21 = arith.subf %20, %15 : vector<16x128xf32>
    %22 = math.log %21 : vector<16x128xf32>
    %cst_9 = arith.constant -1.000000e+02 : f32
    %23 = vector.broadcast %cst_9 : f32 to vector<16x128xf32>
    %24 = arith.maximumf %22, %23 : vector<16x128xf32>
    %25 = arith.mulf %4, %19 : vector<16x128xf32>
    %cst_10 = arith.constant 1.000000e+00 : f32
    %26 = vector.broadcast %cst_10 : f32 to vector<16x128xf32>
    %27 = arith.subf %26, %4 : vector<16x128xf32>
    %28 = arith.mulf %27, %24 : vector<16x128xf32>
    %29 = arith.addf %25, %28 : vector<16x128xf32>
    %cst_11 = arith.constant 0.000000e+00 : f32
    %30 = vector.broadcast %cst_11 : f32 to vector<16x128xf32>
    %31 = arith.subf %30, %29 : vector<16x128xf32>
    %c0_12 = arith.constant 0 : index
    %c0_13 = arith.constant 0 : index
    %c0_14 = arith.constant 0 : index
    %32 = vector.load %arg4[%c0_12, %c0_13, %c0_14] : memref<1x24x128xf32, #tpu.memory_space<vmem>>, vector<1x8x128xf32>
    %33 = vector.shape_cast %32 : vector<1x8x128xf32> to vector<8x128xf32>
    %34 = vector.shape_cast %16 : vector<16x128xf32> to vector<2x8x128xf32>
    %cst_15 = arith.constant dense<0.000000e+00> : vector<8x128xf32>
    %35 = vector.multi_reduction <add>, %34, %cst_15 [0] : vector<2x8x128xf32> to vector<8x128xf32>
    %36 = arith.addf %33, %35 : vector<8x128xf32>
    %c0_16 = arith.constant 0 : index
    %c0_17 = arith.constant 0 : index
    %c0_18 = arith.constant 0 : index
    %37 = vector.load %arg4[%c0_16, %c0_17, %c0_18] : memref<1x24x128xf32, #tpu.memory_space<vmem>>, vector<1x8x128xf32>
    %38 = vector.shape_cast %37 : vector<1x8x128xf32> to vector<8x128xf32>
    %39 = vector.shape_cast %36 : vector<8x128xf32> to vector<1x8x128xf32>
    tpu.vector_store %arg4[%c0_16, %c0_17, %c0_18], %39 {strides = array<i32>} : memref<1x24x128xf32, #tpu.memory_space<vmem>>, vector<1x8x128xf32>,
    %40 = arith.mulf %16, %16 : vector<16x128xf32>
    %c0_19 = arith.constant 0 : index
    %c8 = arith.constant 8 : index
    %c0_20 = arith.constant 0 : index
    %41 = vector.load %arg4[%c0_19, %c8, %c0_20] : memref<1x24x128xf32, #tpu.memory_space<vmem>>, vector<1x8x128xf32>
    %42 = vector.shape_cast %41 : vector<1x8x128xf32> to vector<8x128xf32>
    %43 = vector.shape_cast %40 : vector<16x128xf32> to vector<2x8x128xf32>
    %cst_21 = arith.constant dense<0.000000e+00> : vector<8x128xf32>
    %44 = vector.multi_reduction <add>, %43, %cst_21 [0] : vector<2x8x128xf32> to vector<8x128xf32>
    %45 = arith.addf %42, %44 : vector<8x128xf32>
    %c0_22 = arith.constant 0 : index
    %c8_23 = arith.constant 8 : index
    %c0_24 = arith.constant 0 : index
    %46 = vector.load %arg4[%c0_22, %c8_23, %c0_24] : memref<1x24x128xf32, #tpu.memory_space<vmem>>, vector<1x8x128xf32>
    %47 = vector.shape_cast %46 : vector<1x8x128xf32> to vector<8x128xf32>
    %48 = vector.shape_cast %45 : vector<8x128xf32> to vector<1x8x128xf32>
    tpu.vector_store %arg4[%c0_22, %c8_23, %c0_24], %48 {strides = array<i32>} : memref<1x24x128xf32, #tpu.memory_space<vmem>>, vector<1x8x128xf32>,
    %c0_25 = arith.constant 0 : index
    %c16 = arith.constant 16 : index
    %c0_26 = arith.constant 0 : index
    %49 = vector.load %arg4[%c0_25, %c16, %c0_26] : memref<1x24x128xf32, #tpu.memory_space<vmem>>, vector<1x8x128xf32>
    %50 = vector.shape_cast %49 : vector<1x8x128xf32> to vector<8x128xf32>
    %51 = vector.shape_cast %31 : vector<16x128xf32> to vector<2x8x128xf32>
    %cst_27 = arith.constant dense<0.000000e+00> : vector<8x128xf32>
    %52 = vector.multi_reduction <add>, %51, %cst_27 [0] : vector<2x8x128xf32> to vector<8x128xf32>
    %53 = arith.addf %50, %52 : vector<8x128xf32>
    %c0_28 = arith.constant 0 : index
    %c16_29 = arith.constant 16 : index
    %c0_30 = arith.constant 0 : index
    %54 = vector.load %arg4[%c0_28, %c16_29, %c0_30] : memref<1x24x128xf32, #tpu.memory_space<vmem>>, vector<1x8x128xf32>
    %55 = vector.shape_cast %54 : vector<1x8x128xf32> to vector<8x128xf32>
    %56 = vector.shape_cast %53 : vector<8x128xf32> to vector<1x8x128xf32>
    tpu.vector_store %arg4[%c0_28, %c16_29, %c0_30], %56 {strides = array<i32>} : memref<1x24x128xf32, #tpu.memory_space<vmem>>, vector<1x8x128xf32>,
    return
  }
  func.func @transform_0(%arg0: i32, %arg1: i32) -> (i32, i32) {
    %c1_i32 = arith.constant 1 : i32
    %0 = arith.muli %arg0, %c1_i32 : i32
    %1 = arith.addi %0, %arg1 : i32
    %c0_i32 = arith.constant 0 : i32
    %2 = arith.minsi %1, %c0_i32 : i32
    %c0_i32_0 = arith.constant 0 : i32
    %c0_i32_1 = arith.constant 0 : i32
    return %2, %c0_i32_0 : i32, i32
  }
  func.func @transform_1(%arg0: i32, %arg1: i32) -> (i32, i32) {
    %c1_i32 = arith.constant 1 : i32
    %0 = arith.muli %arg0, %c1_i32 : i32
    %1 = arith.addi %0, %arg1 : i32
    %c0_i32 = arith.constant 0 : i32
    %2 = arith.minsi %1, %c0_i32 : i32
    %c0_i32_0 = arith.constant 0 : i32
    %c0_i32_1 = arith.constant 0 : i32
    return %2, %c0_i32_0 : i32, i32
  }
  func.func @transform_2(%arg0: i32, %arg1: i32) -> (i32, i32, i32) {
    %c0_i32 = arith.constant 0 : i32
    %c0_i32_0 = arith.constant 0 : i32
    %c0_i32_1 = arith.constant 0 : i32
    return %arg0, %c0_i32, %c0_i32_0 : i32, i32, i32
  }
}

</mosaic_0001>

<bundles_post_ra>
// kernel: tpu_custom_call.1
= control target key start
LH: loop header
LB: loop body
LE: loop exit
PB: predicated region body
PF: predicated region fallthrough
CT: control target
= control target key end

     0   :  { %7 = vsyncpa [#allocation3], 0  ;;  %s316_s0 = inlined_call_operand.hbm [shape: f32[16,128], index: 0, kind: input, shape index: {}]   ;;  %s317_s1 = inlined_call_operand.hbm [shape: f32[16,128], index: 1, kind: input, shape index: {}]   ;;  %s318_s2 = inlined_call_operand.hbm [shape: f32[1,24,128], index: 2, kind: output, shape index: {}]  }
   0x1   :  { %8 = vsyncpa [#allocation6], 0 }
   0x2   :  { %9 = vsyncpa [#allocation4], 0  ;;  %s251_s9 = smov [#allocation2]   ;;  %s179_s13 = scalar_lea.hbm %s316_s0, 256 }
   0x3   :  { %s21_s10 = sshll.u32 %s251_s9, 4  ;;  %p180_p0 = scmp.ne.s32.totalorder %s316_s0, %s179_s13  ;;  %s22_s10 = int_to_ptr.vmem [resolvable:$true] %s21_s10 }
   0x4   :  { %p183_p1 = scmp.lt.u32.totalorder %s179_s13, %s316_s0 }
   0x6   :  { %p185_p2 = pnand %p183_p1, %p180_p0 }
   0x8   :  { %188 = shalt.err (!%p185_p2)
}
   0x9   :  { %s189_s18 = scalar_lea.vmem %s22_s10, 256  ;;  %p194_p4 = scmp.lt.s32.totalorder %s22_s10, %s22_s10 }
   0xa   :  { %p190_p3 = scmp.ne.s32.totalorder %s22_s10, %s189_s18  ;;  %p195_p5 = scmp.lt.s32.totalorder %s189_s18, %s189_s18 }
   0xc   :  { %p196_p6 = por %p195_p5, %p194_p4 }
   0xe   :  { %p197_p7 = pnand %p196_p6, %p190_p3 }
  0x10   :  { %200 = shalt.err (!%p197_p7)
}
  0x11   :  { %s252_s19 = smov 128   ;;  %s253_s20 = smov 8  }
  0x12   :  { %27 = dma.hbm_to_vmem [thread:$0]  %s316_s0, 256, %s22_s10, [#allocation3], %s252_s19, %s252_s19, %s253_s20  }
  0x13   :  { %s254_s23 = smov [#allocation5]   ;;  %s201_s27 = scalar_lea.hbm %s317_s1, 256 }
  0x14   :  { %s39_s24 = sshll.u32 %s254_s23, 4  ;;  %p202_p8 = scmp.ne.s32.totalorder %s317_s1, %s201_s27  ;;  %s40_s24 = int_to_ptr.vmem [resolvable:$true] %s39_s24 }
  0x15   :  { %p205_p9 = scmp.lt.u32.totalorder %s201_s27, %s317_s1 }
  0x17   :  { %p207_p10 = pnand %p205_p9, %p202_p8 }
  0x19   :  { %210 = shalt.err (!%p207_p10)
}
  0x1a   :  { %s211_s4 = scalar_lea.vmem %s40_s24, 256  ;;  %p216_p12 = scmp.lt.s32.totalorder %s40_s24, %s40_s24 }
  0x1b   :  { %p212_p11 = scmp.ne.s32.totalorder %s40_s24, %s211_s4  ;;  %p217_p13 = scmp.lt.s32.totalorder %s211_s4, %s211_s4 }
  0x1d   :  { %p218_p0 = por %p217_p13, %p216_p12 }
  0x1f   :  { %p219_p1 = pnand %p218_p0, %p212_p11 }
  0x21   :  { %222 = shalt.err (!%p219_p1)
}
  0x22   :  { %45 = dma.hbm_to_vmem [thread:$0]  %s317_s1, 256, %s40_s24, [#allocation6], %s252_s19, %s252_s19, %s253_s20  }
  0x23   :  { %245 = dma.done.wait [#allocation3], 256  }
  0x24   :  { %246 = vsyncadd [#allocation3], 4294967040 }
  0x25   :  { %247 = dma.done.wait [#allocation6], 256  }
  0x26   :  { %248 = vsyncadd [#allocation6], 4294967040  ;;  %v67_v0 = vld [vmem:[#allocation2] sm:$0xff]  ;;  %v68_v1 = vld [vmem:[#allocation2 + $0x8] sm:$0xff]  ;;  %s255_s1 = smov [#allocation7]  }
  0x27   :  { %v71_v2 = vand.u32 2147483647, %v67_v0  ;;  %v72_v3 = vand.u32 2147483647, %v68_v1  ;;  %vm79_vm0 = vcmp.ge.f32.partialorder %v67_v0, 0.0  ;;  %vm80_vm1 = vcmp.ge.f32.partialorder %v68_v1, 0.0 }
  0x28   :  { %v69_v26 = vld [vmem:[#allocation5] sm:$0xff]  ;;  %v70_v30 = vld [vmem:[#allocation5 + $0x8] sm:$0xff]  ;;  %s136_s6 = sshll.u32 %s255_s1, 4  ;;  %s137_s6 = int_to_ptr.vmem [resolvable:$true] %s136_s6 }
  0x29   :  { %v73_v4 = vsub.f32 0.0, %v71_v2  ;;  %v74_v5 = vsub.f32 0.0, %v72_v3  ;;  %v109_v38 = vsub.f32 1.0, %v69_v26  ;;  %v110_v41 = vsub.f32 1.0, %v70_v30  ;;  %s223_s7 = scalar_lea.vmem %s137_s6, 384  ;;  %p228_p3 = scmp.lt.s32.totalorder %s137_s6, %s137_s6 }
  0x2a   :  { %p224_p2 = scmp.ne.s32.totalorder %s137_s6, %s223_s7  ;;  %p229_p4 = scmp.lt.s32.totalorder %s223_s7, %s223_s7 }
  0x2b   :  { %v75_v6 = vmul.f32 1.442695, %v73_v4  ;;  %v77_v7 = vmul.f32 1.442695, %v74_v5 }
  0x2c   :  { %p230_p5 = por %p229_p4, %p228_p3 }
  0x2d   :  { %159 = vpow2.f32 %v75_v6 }
  0x2e   :  { %161 = vpow2.f32 %v77_v7  ;;  %p231_p6 = pnand %p230_p5, %p224_p2 }
  0x37   :  { %v160_v8 = vpop.eup %159 }
  0x38   :  { %v162_v9 = vpop.eup %161  ;;  %v83_v10 = vadd.f32 1.0, %v160_v8  ;;  %v81_v12 = vsel %vm79_vm0, 1.0, %v160_v8 }
  0x39   :  { %v84_v11 = vadd.f32 1.0, %v162_v9  ;;  %v82_v13 = vsel %vm80_vm1, 1.0, %v162_v9 }
  0x3a   :  { %163 = vrcp.f32 %v83_v10 }
  0x3b   :  { %165 = vrcp.f32 %v84_v11 }
  0x44   :  { %v164_v14 = vpop.eup %163 }
  0x45   :  { %v166_v15 = vpop.eup %165  ;;  %v86_v16 = vmul.f32 %v164_v14, %v81_v12 }
  0x46   :  { %v88_v17 = vmul.f32 %v166_v15, %v82_v13 }
  0x47   :  { %v89_v18 = vmul.f32 1.442695, %v86_v16  ;;  %167 = vlog2.f32 %v86_v16  ;;  %v99_v19 = vsub.f32 1.0, %v86_v16 }
  0x48   :  { %v91_v20 = vmul.f32 1.442695, %v88_v17  ;;  %169 = vlog2.f32 %v88_v17  ;;  %v100_v21 = vsub.f32 1.0, %v88_v17 }
  0x49   :  { %171 = vpow2.f32 %v89_v18 }
  0x4a   :  { %173 = vpow2.f32 %v91_v20 }
  0x4b   :  { %175 = vlog2.f32 %v99_v19 }
  0x4c   :  { %177 = vlog2.f32 %v100_v21 }
  0x51   :  { %v168_v22 = vpop.eup %167 }
  0x52   :  { %v170_v23 = vpop.eup %169  ;;  %v94_v24 = vmul.f32 0.6931472, %v168_v22 }
  0x53   :  { %v172_v25 = vpop.eup %171  ;;  %v96_v27 = vmul.f32 0.6931472, %v170_v23 }
  0x54   :  { %v174_v28 = vpop.eup %173  ;;  %v121_v29 = vmul.f32 %v172_v25, %v172_v25  ;;  %v97_v31 = vmax.f32 %v94_v24, -100.0 }
  0x55   :  { %v176_v32 = vpop.eup %175  ;;  %v118_v33 = vadd.f32 %v174_v28, %v172_v25  ;;  %v122_v34 = vmul.f32 %v174_v28, %v174_v28  ;;  %v98_v35 = vmax.f32 %v96_v27, -100.0 }
  0x56   :  { %v178_v36 = vpop.eup %177  ;;  %v102_v37 = vmul.f32 0.6931472, %v176_v32  ;;  %v107_v43 = vmul.f32 %v97_v31, %v69_v26 }
  0x57   :  { %v124_v39 = vadd.f32 %v122_v34, %v121_v29  ;;  %v104_v40 = vmul.f32 0.6931472, %v178_v36  ;;  %120 = vst [vmem:[#allocation7] sm:$0xff] %v118_v33  ;;  %v108_v45 = vmul.f32 %v98_v35, %v70_v30 }
  0x58   :  { %v105_v42 = vmax.f32 %v102_v37, -100.0 }
  0x59   :  { %v106_v44 = vmax.f32 %v104_v40, -100.0  ;;  %126 = vst [vmem:[#allocation7 + $0x8] sm:$0xff] %v124_v39 }
  0x5a   :  { %v111_v46 = vmul.f32 %v109_v38, %v105_v42 }
  0x5b   :  { %v112_v47 = vmul.f32 %v110_v41, %v106_v44 }
  0x5c   :  { %v113_v48 = vadd.f32 %v111_v46, %v107_v43 }
  0x5d   :  { %v114_v49 = vadd.f32 %v112_v47, %v108_v45 }
  0x5e   :  { %v115_v50 = vsub.f32 0.0, %v113_v48 }
  0x5f   :  { %v116_v51 = vsub.f32 0.0, %v114_v49 }
  0x61   :  { %v128_v52 = vadd.f32 %v116_v51, %v115_v50 }
  0x63   :  { %130 = vst [vmem:[#allocation7 + $0x10] sm:$0xff] %v128_v52 }
  0x64   :  { %234 = shalt.err (!%p231_p6)
}
  0x65   :  { %s235_s10 = scalar_lea.hbm %s318_s2, 384 }
  0x66   :  { %p236_p7 = scmp.ne.s32.totalorder %s318_s2, %s235_s10  ;;  %p239_p8 = scmp.lt.u32.totalorder %s235_s10, %s318_s2 }
  0x68   :  { %p241_p9 = pnand %p239_p8, %p236_p7 }
  0x6a   :  { %244 = shalt.err (!%p241_p9)
}
  0x6b   :  { %142 = dma.vmem_to_hbm [thread:$0]  %s137_s6, 384, %s318_s2, [#allocation4], %s252_s19, %s252_s19, %s253_s20  }
  0x6c   :  { %249 = dma.done.wait [#allocation4], 384  }
  0x6d   :  { %250 = vsyncadd [#allocation4], 4294966912 }
  0x6e   :  { %146 = vsyncpa [#allocation3], 1 }
  0x6f   :  { %147 = vsyncpa [#allocation6], 1 }
  0x70   :  { %148 = vsyncpa [#allocation4], 1 }

</bundles_post_ra>
